<compile_context>
chip_gen: v6e
topology: v6e:2x2x1
jax: 0.10.0
libtpu: 0.0.40
codegen_flags: <defaults>
</compile_context>

<pallas_src>
import functools

import jax
import jax.numpy as jnp
import numpy as np
from jax.experimental import pallas as pl
from jax.experimental.pallas import tpu as pltpu


def _char_rnn_kernel(x_ref, h0_ref, wih_ref, whh_ref, b_ref, wfc_ref, bfc_ref,
                     out_ref, hout_ref, *, seq_len, batch):
    # 1) Input projection for ALL timesteps as ONE bf16 MXU matmul (f32 acc),
    #    with the RNN bias (b_ih + b_hh) folded in here -- hoisted entirely out
    #    of the serial recurrence.  Kept as a value (T*B=64 x H=128 f32 = 8
    #    vregs), no VMEM scratch.
    xp = (
        jnp.dot(x_ref[...], wih_ref[...], preferred_element_type=jnp.float32)
        + b_ref[...]
    )                                                    # (T*B, H) f32

    # Loop-invariant RHS, loaded once; Mosaic keeps it staged across the
    # unrolled recurrence (no explicit matmul_push_rhs driving needed here).
    w_hh = whh_ref[...]                                  # (H, H) bf16

    # 2) Strictly serial recurrence, fully unrolled (static T=8): one bf16 MXU
    #    push + one EUP tanh per step on the critical path.  h stays f32; cast
    #    to bf16 only at the MXU input boundary (v5e-safe).
    h = h0_ref[...]                                      # (B, H) f32
    for t in range(seq_len):
        xp_t = xp[t * batch:(t + 1) * batch, :]          # static slice, 1 vreg
        hw = jnp.dot(h.astype(jnp.bfloat16), w_hh,
                     preferred_element_type=jnp.float32)
        h = jnp.tanh(xp_t + hw)
    # TODO(synk): for large T, switch to lax.fori_loop with a bounded unroll
    # (e.g. 8) and a time-chunked input projection so code size / VMEM stay
    # bounded (v7x has only 64 MiB VMEM); at T=8 full unroll is optimal.

    # 3) Final hidden state + fc on the last timestep (bf16 MXU, f32 acc).
    hout_ref[...] = h
    out_ref[...] = (
        jnp.dot(h.astype(jnp.bfloat16), wfc_ref[...],
                preferred_element_type=jnp.float32)
        + bfc_ref[...]
    )


def char_rnn_forward(x, hidden, params):
    """x: (B, T, D_in) float32, hidden: (1, B, H) float32.

    Returns (out, hidden_out) with out: (B, O), hidden_out: (1, B, H),
    matching CharRNN.forward semantics.
    """
    B, T, D_in = x.shape
    H = params["w_hh"].shape[0]
    O = params["w_fc"].shape[1]

    # Time-major + flattened over (T, B) so the input projection is a single
    # (T*B, D_in) @ (D_in, H) matmul inside the kernel.  (At larger shapes have
    # the producer emit time-major x to avoid this extra HBM pass.)
    x_flat = (jnp.transpose(x, (1, 0, 2))
              .reshape(T * B, D_in)
              .astype(jnp.bfloat16))
    h0 = hidden[0]                                       # (B, H) f32
    b_rnn = (params["b_ih"] + params["b_hh"]).reshape(1, H).astype(jnp.float32)
    b_fc = params["b_fc"].reshape(1, O).astype(jnp.float32)

    vmem = lambda: pl.BlockSpec(memory_space=pltpu.MemorySpace.VMEM)

    out, h_last = pl.pallas_call(
        functools.partial(_char_rnn_kernel, seq_len=T, batch=B),
        out_shape=(
            jax.ShapeDtypeStruct((B, O), jnp.float32),   # fc output
            jax.ShapeDtypeStruct((B, H), jnp.float32),   # final hidden
        ),
        in_specs=[vmem() for _ in range(7)],
        out_specs=(vmem(), vmem()),
    )(
        x_flat,
        h0,
        params["w_ih"].astype(jnp.bfloat16),
        params["w_hh"].astype(jnp.bfloat16),
        b_rnn,
        params["w_fc"].astype(jnp.bfloat16),
        b_fc,
    )

    return out, h_last[None, :, :]                       # hidden back to (1, B, H)


def init_params(key, input_size, hidden_size, output_size):
    """Deterministic init mimicking PyTorch's uniform(-1/sqrt(H), 1/sqrt(H))."""
    ks = jax.random.split(key, 6)
    bound = 1.0 / np.sqrt(hidden_size)
    u = lambda k, shape: jax.random.uniform(k, shape, jnp.float32, -bound, bound)
    return {
        # stored pre-transposed relative to PyTorch (so kernel does x @ W)
        "w_ih": u(ks[0], (input_size, hidden_size)),
        "w_hh": u(ks[1], (hidden_size, hidden_size)),
        "b_ih": u(ks[2], (hidden_size,)),
        "b_hh": u(ks[3], (hidden_size,)),
        "w_fc": u(ks[4], (hidden_size, output_size)),
        "b_fc": u(ks[5], (output_size,)),
    }


def char_rnn_reference(x, hidden, params):
    """Pure-JAX f32 reference of the PyTorch forward pass."""
    h = hidden[0]
    b = params["b_ih"] + params["b_hh"]

    def step(h, x_t):
        h_new = jnp.tanh(x_t @ params["w_ih"] + h @ params["w_hh"] + b)
        return h_new, h_new

    h_last, _ = jax.lax.scan(step, h, jnp.transpose(x, (1, 0, 2)))
    out = h_last @ params["w_fc"] + params["b_fc"]
    return out, h_last[None, :, :]


if __name__ == "__main__":
    # Sublane/lane-aligned small shapes; hidden_size matches the module spec.
    B, T = 8, 8
    input_size, hidden_size, output_size = 64, 128, 128

    key = jax.random.PRNGKey(0)
    k_x, k_p = jax.random.split(key)

    x = jax.random.normal(k_x, (B, T, input_size), dtype=jnp.float32)
    hidden = jnp.zeros((1, B, hidden_size), dtype=jnp.float32)  # init_hidden
    params = init_params(k_p, input_size, hidden_size, output_size)

    out, h_out = char_rnn_forward(x, hidden, params)
    out = jax.block_until_ready(out)
    h_out = jax.block_until_ready(h_out)

    out_ref, h_ref = char_rnn_reference(x, hidden, params)
    # bf16 MXU inputs (f32 accumulation) vs. full-f32 reference: ~1e-3..1e-2
    # level agreement expected after T tanh steps; 2e-2 gives headroom.
    np.testing.assert_allclose(np.asarray(out), np.asarray(out_ref),
                               rtol=2e-2, atol=2e-2)
    np.testing.assert_allclose(np.asarray(h_out), np.asarray(h_ref),
                               rtol=2e-2, atol=2e-2)

    print("KERNEL_OK")
</pallas_src>

<mosaic_0001>
module attributes {stable_mosaic.version = 11 : i64} {
  func.func @_char_rnn_kernel(%arg0: memref<64x64xbf16, #tpu.memory_space<vmem>>, %arg1: memref<8x128xf32, #tpu.memory_space<vmem>>, %arg2: memref<64x128xbf16, #tpu.memory_space<vmem>>, %arg3: memref<128x128xbf16, #tpu.memory_space<vmem>>, %arg4: memref<1x128xf32, #tpu.memory_space<vmem>>, %arg5: memref<128x128xbf16, #tpu.memory_space<vmem>>, %arg6: memref<1x128xf32, #tpu.memory_space<vmem>>, %arg7: memref<8x128xf32, #tpu.memory_space<vmem>>, %arg8: memref<8x128xf32, #tpu.memory_space<vmem>>) attributes {dimension_semantics = [], scalar_prefetch = 0 : i64, scratch_operands = 0 : i64, tpu.core_type = #tpu.core_type<tc>} {
    %c0 = arith.constant 0 : index
    %c0_0 = arith.constant 0 : index
    %0 = vector.load %arg0[%c0, %c0_0] : memref<64x64xbf16, #tpu.memory_space<vmem>>, vector<64x64xbf16>
    %c0_1 = arith.constant 0 : index
    %c0_2 = arith.constant 0 : index
    %1 = vector.load %arg2[%c0_1, %c0_2] : memref<64x128xbf16, #tpu.memory_space<vmem>>, vector<64x128xbf16>
    %cst = arith.constant dense<0.000000e+00> : vector<64x128xf32>
    %2 = tpu.matmul %0, %1, %cst {dimension_numbers = #tpu.dot_dimension_numbers<[1], [0], [0], [1], [0, 0, 1, 1], [], []>} : vector<64x64xbf16>, vector<64x128xbf16>, vector<64x128xf32> -> vector<64x128xf32>
    %c0_3 = arith.constant 0 : index
    %c0_4 = arith.constant 0 : index
    %3 = vector.load %arg4[%c0_3, %c0_4] : memref<1x128xf32, #tpu.memory_space<vmem>>, vector<1x128xf32>
    %4 = vector.broadcast %3 : vector<1x128xf32> to vector<64x128xf32>
    %5 = arith.addf %2, %4 : vector<64x128xf32>
    %c0_5 = arith.constant 0 : index
    %c0_6 = arith.constant 0 : index
    %6 = vector.load %arg3[%c0_5, %c0_6] : memref<128x128xbf16, #tpu.memory_space<vmem>>, vector<128x128xbf16>
    %c0_7 = arith.constant 0 : index
    %c0_8 = arith.constant 0 : index
    %7 = vector.load %arg1[%c0_7, %c0_8] : memref<8x128xf32, #tpu.memory_space<vmem>>, vector<8x128xf32>
    %8 = vector.extract_strided_slice %5 {offsets = [0, 0], sizes = [8, 128], strides = [1, 1]} : vector<64x128xf32> to vector<8x128xf32>
    %9 = arith.truncf %7 : vector<8x128xf32> to vector<8x128xbf16>
    %cst_9 = arith.constant dense<0.000000e+00> : vector<8x128xf32>
    %10 = tpu.matmul %9, %6, %cst_9 {dimension_numbers = #tpu.dot_dimension_numbers<[1], [0], [0], [1], [0, 0, 1, 1], [], []>} : vector<8x128xbf16>, vector<128x128xbf16>, vector<8x128xf32> -> vector<8x128xf32>
    %11 = arith.addf %8, %10 : vector<8x128xf32>
    %12 = math.tanh %11 : vector<8x128xf32>
    %13 = vector.extract_strided_slice %5 {offsets = [8, 0], sizes = [8, 128], strides = [1, 1]} : vector<64x128xf32> to vector<8x128xf32>
    %14 = arith.truncf %12 : vector<8x128xf32> to vector<8x128xbf16>
    %cst_10 = arith.constant dense<0.000000e+00> : vector<8x128xf32>
    %15 = tpu.matmul %14, %6, %cst_10 {dimension_numbers = #tpu.dot_dimension_numbers<[1], [0], [0], [1], [0, 0, 1, 1], [], []>} : vector<8x128xbf16>, vector<128x128xbf16>, vector<8x128xf32> -> vector<8x128xf32>
    %16 = arith.addf %13, %15 : vector<8x128xf32>
    %17 = math.tanh %16 : vector<8x128xf32>
    %18 = vector.extract_strided_slice %5 {offsets = [16, 0], sizes = [8, 128], strides = [1, 1]} : vector<64x128xf32> to vector<8x128xf32>
    %19 = arith.truncf %17 : vector<8x128xf32> to vector<8x128xbf16>
    %cst_11 = arith.constant dense<0.000000e+00> : vector<8x128xf32>
    %20 = tpu.matmul %19, %6, %cst_11 {dimension_numbers = #tpu.dot_dimension_numbers<[1], [0], [0], [1], [0, 0, 1, 1], [], []>} : vector<8x128xbf16>, vector<128x128xbf16>, vector<8x128xf32> -> vector<8x128xf32>
    %21 = arith.addf %18, %20 : vector<8x128xf32>
    %22 = math.tanh %21 : vector<8x128xf32>
    %23 = vector.extract_strided_slice %5 {offsets = [24, 0], sizes = [8, 128], strides = [1, 1]} : vector<64x128xf32> to vector<8x128xf32>
    %24 = arith.truncf %22 : vector<8x128xf32> to vector<8x128xbf16>
    %cst_12 = arith.constant dense<0.000000e+00> : vector<8x128xf32>
    %25 = tpu.matmul %24, %6, %cst_12 {dimension_numbers = #tpu.dot_dimension_numbers<[1], [0], [0], [1], [0, 0, 1, 1], [], []>} : vector<8x128xbf16>, vector<128x128xbf16>, vector<8x128xf32> -> vector<8x128xf32>
    %26 = arith.addf %23, %25 : vector<8x128xf32>
    %27 = math.tanh %26 : vector<8x128xf32>
    %28 = vector.extract_strided_slice %5 {offsets = [32, 0], sizes = [8, 128], strides = [1, 1]} : vector<64x128xf32> to vector<8x128xf32>
    %29 = arith.truncf %27 : vector<8x128xf32> to vector<8x128xbf16>
    %cst_13 = arith.constant dense<0.000000e+00> : vector<8x128xf32>
    %30 = tpu.matmul %29, %6, %cst_13 {dimension_numbers = #tpu.dot_dimension_numbers<[1], [0], [0], [1], [0, 0, 1, 1], [], []>} : vector<8x128xbf16>, vector<128x128xbf16>, vector<8x128xf32> -> vector<8x128xf32>
    %31 = arith.addf %28, %30 : vector<8x128xf32>
    %32 = math.tanh %31 : vector<8x128xf32>
    %33 = vector.extract_strided_slice %5 {offsets = [40, 0], sizes = [8, 128], strides = [1, 1]} : vector<64x128xf32> to vector<8x128xf32>
    %34 = arith.truncf %32 : vector<8x128xf32> to vector<8x128xbf16>
    %cst_14 = arith.constant dense<0.000000e+00> : vector<8x128xf32>
    %35 = tpu.matmul %34, %6, %cst_14 {dimension_numbers = #tpu.dot_dimension_numbers<[1], [0], [0], [1], [0, 0, 1, 1], [], []>} : vector<8x128xbf16>, vector<128x128xbf16>, vector<8x128xf32> -> vector<8x128xf32>
    %36 = arith.addf %33, %35 : vector<8x128xf32>
    %37 = math.tanh %36 : vector<8x128xf32>
    %38 = vector.extract_strided_slice %5 {offsets = [48, 0], sizes = [8, 128], strides = [1, 1]} : vector<64x128xf32> to vector<8x128xf32>
    %39 = arith.truncf %37 : vector<8x128xf32> to vector<8x128xbf16>
    %cst_15 = arith.constant dense<0.000000e+00> : vector<8x128xf32>
    %40 = tpu.matmul %39, %6, %cst_15 {dimension_numbers = #tpu.dot_dimension_numbers<[1], [0], [0], [1], [0, 0, 1, 1], [], []>} : vector<8x128xbf16>, vector<128x128xbf16>, vector<8x128xf32> -> vector<8x128xf32>
    %41 = arith.addf %38, %40 : vector<8x128xf32>
    %42 = math.tanh %41 : vector<8x128xf32>
    %43 = vector.extract_strided_slice %5 {offsets = [56, 0], sizes = [8, 128], strides = [1, 1]} : vector<64x128xf32> to vector<8x128xf32>
    %44 = arith.truncf %42 : vector<8x128xf32> to vector<8x128xbf16>
    %cst_16 = arith.constant dense<0.000000e+00> : vector<8x128xf32>
    %45 = tpu.matmul %44, %6, %cst_16 {dimension_numbers = #tpu.dot_dimension_numbers<[1], [0], [0], [1], [0, 0, 1, 1], [], []>} : vector<8x128xbf16>, vector<128x128xbf16>, vector<8x128xf32> -> vector<8x128xf32>
    %46 = arith.addf %43, %45 : vector<8x128xf32>
    %47 = math.tanh %46 : vector<8x128xf32>
    %c0_17 = arith.constant 0 : index
    %c0_18 = arith.constant 0 : index
    %48 = vector.load %arg8[%c0_17, %c0_18] : memref<8x128xf32, #tpu.memory_space<vmem>>, vector<8x128xf32>
    tpu.vector_store %arg8[%c0_17, %c0_18], %47 {strides = array<i32>} : memref<8x128xf32, #tpu.memory_space<vmem>>, vector<8x128xf32>,
    %49 = arith.truncf %47 : vector<8x128xf32> to vector<8x128xbf16>
    %c0_19 = arith.constant 0 : index
    %c0_20 = arith.constant 0 : index
    %50 = vector.load %arg5[%c0_19, %c0_20] : memref<128x128xbf16, #tpu.memory_space<vmem>>, vector<128x128xbf16>
    %cst_21 = arith.constant dense<0.000000e+00> : vector<8x128xf32>
    %51 = tpu.matmul %49, %50, %cst_21 {dimension_numbers = #tpu.dot_dimension_numbers<[1], [0], [0], [1], [0, 0, 1, 1], [], []>} : vector<8x128xbf16>, vector<128x128xbf16>, vector<8x128xf32> -> vector<8x128xf32>
    %c0_22 = arith.constant 0 : index
    %c0_23 = arith.constant 0 : index
    %52 = vector.load %arg6[%c0_22, %c0_23] : memref<1x128xf32, #tpu.memory_space<vmem>>, vector<1x128xf32>
    %53 = vector.broadcast %52 : vector<1x128xf32> to vector<8x128xf32>
    %54 = arith.addf %51, %53 : vector<8x128xf32>
    %c0_24 = arith.constant 0 : index
    %c0_25 = arith.constant 0 : index
    %55 = vector.load %arg7[%c0_24, %c0_25] : memref<8x128xf32, #tpu.memory_space<vmem>>, vector<8x128xf32>
    tpu.vector_store %arg7[%c0_24, %c0_25], %54 {strides = array<i32>} : memref<8x128xf32, #tpu.memory_space<vmem>>, vector<8x128xf32>,
    return
  }
}

</mosaic_0001>

<bundles_post_ra>
// kernel: tpu_custom_call.1
= control target key start
LH: loop header
LB: loop body
LE: loop exit
PB: predicated region body
PF: predicated region fallthrough
CT: control target
= control target key end

     0   :  { %14 = vsyncpa [#allocation3], 0  ;;  %s1606_s0 = inlined_call_operand.hbm [shape: bf16[64,64], index: 0, kind: input, shape index: {}]   ;;  %s1607_s1 = inlined_call_operand.hbm [shape: f32[8,128], index: 1, kind: input, shape index: {}]   ;;  %s1608_s2 = inlined_call_operand.hbm [shape: bf16[64,128], index: 2, kind: input, shape index: {}]   ;;  %s1609_s3 = inlined_call_operand.hbm [shape: bf16[128,128], index: 3, kind: input, shape index: {}]   ;;  %s1610_s4 = inlined_call_operand.vmem [shape: f32[1,128], index: 4, kind: input, shape index: {}]   ;;  %s1611_s5 = inlined_call_operand.hbm [shape: bf16[128,128], index: 5, kind: input, shape index: {}]   ;;  %s1612_s6 = inlined_call_operand.vmem [shape: f32[1,128], index: 6, kind: input, shape index: {}]   ;;  %s1613_s7 = inlined_call_operand.hbm [shape: f32[8,128], index: 7, kind: output, shape index: {0}]   ;;  %s1614_s8 = inlined_call_operand.hbm [shape: f32[8,128], index: 8, kind: output, shape index: {1}]  }
   0x1   :  { %15 = vsyncpa [#allocation6], 0 }
   0x2   :  { %16 = vsyncpa [#allocation9], 0 }
   0x3   :  { %17 = vsyncpa [#allocation4], 0 }
   0x4   :  { %18 = vsyncpa [#allocation13], 0  ;;  %s1312_s27 = smov [#allocation5]  }
   0x5   :  { %s37_s28 = sshll.u32 %s1312_s27, 4  ;;  %s38_s28 = int_to_ptr.vmem [resolvable:$true] %s37_s28 }
   0x6   :  { %s1170_s29 = scalar_lea.vmem %s38_s28, 128  ;;  %p1175_p1 = scmp.lt.s32.totalorder %s38_s28, %s38_s28 }
   0x7   :  { %p1171_p0 = scmp.ne.s32.totalorder %s38_s28, %s1170_s29  ;;  %p1176_p2 = scmp.lt.s32.totalorder %s1170_s29, %s1170_s29 }
   0x9   :  { %p1177_p3 = por %p1176_p2, %p1175_p1 }
   0xb   :  { %p1178_p4 = pnand %p1177_p3, %p1171_p0 }
   0xd   :  { %1181 = shalt.err (!%p1178_p4)
}
   0xe   :  { %40 = dma.hbm_to_vmem [thread:$0]  %s1607_s1, 128, %s38_s28, [#allocation6]  }
   0xf   :  { %s1313_s10 = smov [#allocation8]   ;;  %s1314_s12 = smov [#allocation2]  }
  0x10   :  { %s58_s11 = sshll.u32 %s1313_s10, 4  ;;  %s24_s13 = sshll.u32 %s1314_s12, 4  ;;  %s59_s11 = int_to_ptr.vmem [resolvable:$true] %s58_s11  ;;  %s25_s13 = int_to_ptr.vmem [resolvable:$true] %s24_s13 }
  0x11   :  { %s1190_s14 = scalar_lea.vmem %s59_s11, 1024  ;;  %p1195_p6 = scmp.lt.s32.totalorder %s59_s11, %s59_s11 }
  0x12   :  { %p1191_p5 = scmp.ne.s32.totalorder %s59_s11, %s1190_s14  ;;  %p1196_p7 = scmp.lt.s32.totalorder %s1190_s14, %s1190_s14 }
  0x14   :  { %p1197_p8 = por %p1196_p7, %p1195_p6 }
  0x16   :  { %p1198_p9 = pnand %p1197_p8, %p1191_p5 }
  0x18   :  { %1201 = shalt.err (!%p1198_p9)
}
  0x19   :  { %s1315_s15 = smov 64   ;;  %s1316_s16 = smov 4  }
  0x1a   :  { %64 = dma.hbm_to_vmem [thread:$0]  %s1609_s3, 1024, %s59_s11, [#allocation9], %s1315_s15, %s1315_s15, %s1316_s16  }
  0x1b   :  { %s1210_s1 = scalar_lea.vmem %s25_s13, 512  ;;  %p1215_p11 = scmp.lt.s32.totalorder %s25_s13, %s25_s13 }
  0x1c   :  { %p1211_p10 = scmp.ne.s32.totalorder %s25_s13, %s1210_s1  ;;  %p1216_p12 = scmp.lt.s32.totalorder %s1210_s1, %s1210_s1 }
  0x1e   :  { %p1217_p13 = por %p1216_p12, %p1215_p11 }
  0x20   :  { %p1218_p0 = pnand %p1217_p13, %p1211_p10 }
  0x22   :  { %1221 = shalt.err (!%p1218_p0)
}
  0x23   :  { %30 = dma.hbm_to_vmem [thread:$0]  %s1606_s0, 512, %s25_s13, [#allocation3], %s1315_s15, %s1315_s15, %s1316_s16  }
  0x24   :  { %s1317_s21 = smov [#allocation7]   ;;  %s1318_s23 = smov [#allocation10]  }
  0x25   :  { %s46_s22 = sshll.u32 %s1317_s21, 4  ;;  %s72_s3 = sshll.u32 %s1318_s23, 4  ;;  %s47_s22 = int_to_ptr.vmem [resolvable:$true] %s46_s22  ;;  %s73_s3 = int_to_ptr.vmem [resolvable:$true] %s72_s3 }
  0x26   :  { %s1230_s24 = scalar_lea.vmem %s47_s22, 512  ;;  %p1235_p2 = scmp.lt.s32.totalorder %s47_s22, %s47_s22 }
  0x27   :  { %p1231_p1 = scmp.ne.s32.totalorder %s47_s22, %s1230_s24  ;;  %p1236_p3 = scmp.lt.s32.totalorder %s1230_s24, %s1230_s24 }
  0x29   :  { %p1237_p4 = por %p1236_p3, %p1235_p2 }
  0x2b   :  { %p1238_p5 = pnand %p1237_p4, %p1231_p1 }
  0x2d   :  { %1241 = shalt.err (!%p1238_p5)
}
  0x2e   :  { %52 = dma.hbm_to_vmem [thread:$0]  %s1608_s2, 512, %s47_s22, [#allocation6], %s1315_s15, %s1315_s15, %s1316_s16  }
  0x2f   :  { %s1250_s0 = scalar_lea.vmem %s73_s3, 1024  ;;  %p1255_p7 = scmp.lt.s32.totalorder %s73_s3, %s73_s3 }
  0x30   :  { %p1251_p6 = scmp.ne.s32.totalorder %s73_s3, %s1250_s0  ;;  %p1256_p8 = scmp.lt.s32.totalorder %s1250_s0, %s1250_s0 }
  0x32   :  { %p1257_p9 = por %p1256_p8, %p1255_p7 }
  0x34   :  { %p1258_p10 = pnand %p1257_p9, %p1251_p6 }
  0x36   :  { %1261 = shalt.err (!%p1258_p10)
}
  0x37   :  { %78 = dma.hbm_to_vmem [thread:$0]  %s1611_s5, 1024, %s73_s3, [#allocation9], %s1315_s15, %s1315_s15, %s1316_s16  }
  0x38   :  { %1302 = dma.done.wait [#allocation3], 512  }
  0x39   :  { %1303 = vsyncadd [#allocation3], 4294966784 }
  0x3a   :  { %1304 = dma.done.wait [#allocation6], 640  }
  0x3b   :  { %1305 = vsyncadd [#allocation6], 4294966656 }
  0x3c   :  { %1306 = dma.done.wait [#allocation9], 2048  }
  0x3d   :  { %1307 = vsyncadd [#allocation9], 4294965248  ;;  %v1319_v0 = vmov 0.0   ;;  %vm1320_vm0 = vmmov 0   ;;  %v1398_v1 = vld [vmem:[#allocation8 + $0x38] sm:$0xff]   ;;  %v1400_v2 = vld [vmem:[#allocation8 + $0x30] sm:$0xff]  }
  0x3e   :  { %931 = vmatprep.subr.bf16.mxu1 %v1319_v0  ;;  %947 = vmatprep.mubr.msk.bf16.mxu1 %vm1320_vm0, %v1319_v0  ;;  %v1124_v3 = vld [vmem:[#allocation7 + $0x18] sm:$0xff]   ;;  %v1126_v4 = vld [vmem:[#allocation7 + $0x10] sm:$0xff]   ;;  %v1404_v5 = vld [vmem:[#allocation8 + $0x28] sm:$0xff]   ;;  %vm164_vm1 = vcmask 523264  }
  0x3f   :  { %932 = vmatpush3.bf16.msra.mxu1 %v1398_v1  ;;  %915 = vmatprep.subr.bf16.mxu0 %v1124_v3  ;;  %v1128_v6 = vld [vmem:[#allocation7 + $0x8] sm:$0xff]   ;;  %v1408_v7 = vld [vmem:[#allocation8 + $0x20] sm:$0xff]   ;;  %v1131_v8 = vld [vmem:[#allocation2] sm:$0xff]  }
  0x40   :  { %933 = vmatprep.subr.bf16.mxu1 %v1319_v0  ;;  %916 = vmatpush3.bf16.msra.mxu0 %v1124_v3  ;;  %v1130_v9 = vld [vmem:[#allocation7] sm:$0xff]   ;;  %v1413_v10 = vld [vmem:[#allocation8 + $0x18] sm:$0xff]   ;;  %v1417_v12 = vld [vmem:[#allocation8 + $0x10] sm:$0xff]  }
  0x41   :  { %917 = vmatprep.subr.bf16.mxu0 %v1126_v4  ;;  %923 = vmatprep.mubr.msk.bf16.mxu0 %vm164_vm1, %v1131_v8  ;;  %v1133_v11 = vld [vmem:[#allocation2 + $0x8] sm:$0xff]   ;;  %v1425_v13 = vld [vmem:[#allocation8 + $0x8] sm:$0xff]   ;;  %v258_v15 = vld [vmem:[#allocation5] sm:$0xff] }
  0x42   :  { %v1431_v14 = vld [vmem:[#allocation8] sm:$0xff]   ;;  %v259_v16 = vpack.c.bf16 %v258_v15, %v258_v15  ;;  %v1136_v17 = vld [vmem:[#allocation2 + $0x10] sm:$0xff]   ;;  %v1137_v18 = vld [vmem:[#allocation2 + $0x18] sm:$0xff]  }
  0x43   :  { %934 = vmatpush3.bf16.msra.mxu1 %v1400_v2  ;;  %v1476_v20 = vld [vmem:[%s1610_s4] ss:$0 sm:$0xff]  ;;  %s1321_s4 = smov [#allocation12]  }
  0x44   :  { %935 = vmatprep.subr.bf16.mxu1 %v1319_v0  ;;  %918 = vmatpush3.bf16.msra.mxu0 %v1126_v4  ;;  %s781_s29 = sshll.u32 %s1321_s4, 4  ;;  %s782_s29 = int_to_ptr.vmem [resolvable:$true] %s781_s29 }
  0x45   :  { %919 = vmatprep.subr.bf16.mxu0 %v1128_v6  ;;  %s1262_s30 = scalar_lea.vmem %s782_s29, 128  ;;  %p1267_p12 = scmp.lt.s32.totalorder %s782_s29, %s782_s29 }
  0x46   :  { %p1263_p11 = scmp.ne.s32.totalorder %s782_s29, %s1262_s30  ;;  %p1268_p13 = scmp.lt.s32.totalorder %s1262_s30, %s1262_s30 }
  0x47   :  { %936 = vmatpush3.bf16.msra.mxu1 %v1404_v5 }
  0x48   :  { %937 = vmatprep.subr.bf16.mxu1 %v1319_v0  ;;  %920 = vmatpush3.bf16.msra.mxu0 %v1128_v6  ;;  %p1269_p0 = por %p1268_p13, %p1267_p12 }
  0x49   :  { %921 = vmatprep.subr.bf16.mxu0 %v1130_v9 }
  0x4a   :  { %p1270_p1 = pnand %p1269_p0, %p1263_p11 }
  0x4b   :  { %938 = vmatpush3.bf16.msra.mxu1 %v1408_v7 }
  0x4c   :  { %939 = vmatprep.subr.bf16.mxu1 %v1319_v0  ;;  %922 = vmatpush3.bf16.msra.mxu0 %v1130_v9 }
  0x4d   :  { %951 = vmatprep.subr.bf16.mxu0 %v1319_v0 }
  0x4f   :  { %940 = vmatpush3.bf16.msra.mxu1 %v1413_v10  ;;  %924 = vmatmul.mubr.msk.bf16.vlgmr.msra.gmra.mxu0 %vm164_vm1, %v1133_v11 }
  0x50   :  { %941 = vmatprep.subr.bf16.mxu1 %v1319_v0  ;;  %952 = vmatpush3.bf16.msra.mxu0 %v1398_v1 }
  0x51   :  { %953 = vmatprep.subr.bf16.mxu0 %v1319_v0  ;;  %927 = vmatprep.mubr.msk.bf16.mxu0 %vm164_vm1, %v1136_v17 }
  0x53   :  { %942 = vmatpush3.bf16.msra.mxu1 %v1417_v12 }
  0x54   :  { %943 = vmatprep.subr.bf16.mxu1 %v1319_v0  ;;  %954 = vmatpush3.bf16.msra.mxu0 %v1400_v2 }
  0x55   :  { %955 = vmatprep.subr.bf16.mxu0 %v1319_v0 }
  0x57   :  { %944 = vmatpush3.bf16.msra.mxu1 %v1425_v13  ;;  %928 = vmatmul.mubr.msk.bf16.gmra.mxu0 %vm164_vm1, %v1137_v18 }
  0x58   :  { %945 = vmatprep.subr.bf16.mxu1 %v1319_v0  ;;  %956 = vmatpush3.bf16.msra.mxu0 %v1404_v5 }
  0x59   :  { %957 = vmatprep.subr.bf16.mxu0 %v1319_v0  ;;  %967 = vmatprep.mubr.msk.bf16.mxu0 %vm1320_vm0, %v1319_v0 }
  0x5b   :  { %946 = vmatpush3.bf16.msra.mxu1 %v1431_v14 }
  0x5c   :  { %971 = vmatprep.subr.bf16.mxu1 %v1319_v0  ;;  %958 = vmatpush3.bf16.msra.mxu0 %v1408_v7 }
  0x5d   :  { %959 = vmatprep.subr.bf16.mxu0 %v1319_v0 }
  0x5e   :  { %948 = vmatmul.mubr.bf16.vlgmr.msra.gmra.mxu1 %v259_v16 }
  0x5f   :  { %972 = vmatpush3.bf16.msra.mxu1 %v1398_v1  ;;  %987 = vmatprep.mubr.msk.bf16.mxu1 %vm1320_vm0, %v1319_v0 }
  0x60   :  { %973 = vmatprep.subr.bf16.mxu1 %v1319_v0  ;;  %960 = vmatpush3.bf16.msra.mxu0 %v1413_v10 }
  0x61   :  { %961 = vmatprep.subr.bf16.mxu0 %v1319_v0 }
  0x63   :  { %974 = vmatpush3.bf16.msra.mxu1 %v1400_v2 }
  0x64   :  { %975 = vmatprep.subr.bf16.mxu1 %v1319_v0  ;;  %962 = vmatpush3.bf16.msra.mxu0 %v1417_v12 }
  0x65   :  { %963 = vmatprep.subr.bf16.mxu0 %v1319_v0 }
  0x67   :  { %976 = vmatpush3.bf16.msra.mxu1 %v1404_v5 }
  0x68   :  { %977 = vmatprep.subr.bf16.mxu1 %v1319_v0  ;;  %964 = vmatpush3.bf16.msra.mxu0 %v1425_v13 }
  0x69   :  { %965 = vmatprep.subr.bf16.mxu0 %v1319_v0 }
  0x6b   :  { %978 = vmatpush3.bf16.msra.mxu1 %v1408_v7 }
  0x6c   :  { %979 = vmatprep.subr.bf16.mxu1 %v1319_v0  ;;  %966 = vmatpush3.bf16.msra.mxu0 %v1431_v14 }
  0x6d   :  { %991 = vmatprep.subr.bf16.mxu0 %v1319_v0 }
  0x6f   :  { %980 = vmatpush3.bf16.msra.mxu1 %v1413_v10 }
  0x70   :  { %981 = vmatprep.subr.bf16.mxu1 %v1319_v0 }
  0x73   :  { %982 = vmatpush3.bf16.msra.mxu1 %v1417_v12 }
  0x74   :  { %983 = vmatprep.subr.bf16.mxu1 %v1319_v0 }
  0x77   :  { %984 = vmatpush3.bf16.msra.mxu1 %v1425_v13 }
  0x78   :  { %985 = vmatprep.subr.bf16.mxu1 %v1319_v0 }
  0x7b   :  { %986 = vmatpush3.bf16.msra.mxu1 %v1431_v14 }
  0x7c   :  { %1011 = vmatprep.subr.bf16.mxu1 %v1319_v0 }
 0x10f   :  { %v1471_v19 = vpop.f32.mrf.mxu0 }
 0x110   :  { %v220_v44 = vadd.f32 %v1471_v19, %v1476_v20 }
 0x111   :  { %v211_v21 = vpop.f32.mrf.mxu0 }
 0x112   :  { %v212_v22 = vadd.f32 %v1476_v20, %v211_v21 }
 0x113   :  { %v926_v30 = vpop.f32.mrf.mxu0 }
 0x114   :  { %v223_v52 = vadd.f32 %v926_v30, %v1476_v20 }
 0x115   :  { %v214_v31 = vpop.f32.mrf.mxu0 }
 0x116   :  { %v215_v36 = vadd.f32 %v1476_v20, %v214_v31 }
 0x117   :  { %v1497_v32 = vpop.f32.mrf.mxu0 }
 0x118   :  { %v236_v16 = vadd.f32 %v1497_v32, %v1476_v20 }
 0x119   :  { %v1499_v33 = vpop.f32.mrf.mxu0 }
 0x11a   :  { %v228_v60 = vadd.f32 %v1476_v20, %v1499_v33 }
 0x11b   :  { %v1501_v34 = vpop.f32.mrf.mxu0 }
 0x11c   :  { %v239_v30 = vadd.f32 %v1501_v34, %v1476_v20 }
 0x11d   :  { %v1503_v35 = vpop.f32.mrf.mxu0 }
 0x11e   :  { %v342_v23 = vpop.f32.mrf.mxu1 }
 0x11f   :  { %v348_v24 = vadd.f32 %v342_v23, %v212_v22 }
 0x120   :  { %v949_v25 = vpop.f32.mrf.mxu1 }
 0x121   :  { %1146 = vtanh.f32 %v348_v24  ;;  %v1141_v25 = vld [vmem:[#allocation10 + $0x20] sm:$0xff]  }
 0x122   :  { %v345_v26 = vpop.f32.mrf.mxu1 }
 0x123   :  { %v1142_v26 = vld [vmem:[#allocation10 + $0x18] sm:$0xff]  }
 0x124   :  { %v950_v27 = vpop.f32.mrf.mxu1 }
 0x125   :  { %v1143_v27 = vld [vmem:[#allocation10 + $0x10] sm:$0xff]  }
 0x12e   :  { %v1147_v28 = vpop.eup %1146 }
 0x12f   :  { %v350_v29 = vpack.c.bf16 %v1147_v28, %v1147_v28  ;;  %v1144_v28 = vld [vmem:[#allocation10 + $0x8] sm:$0xff]  }
 0x131   :  { %968 = vmatmul.mubr.bf16.vlgmr.msra.gmra.mxu0 %v350_v29  ;;  %v1145_v29 = vld [vmem:[#allocation10] sm:$0xff]  }
 0x132   :  { %992 = vmatpush3.bf16.msra.mxu0 %v1398_v1  ;;  %1007 = vmatprep.mubr.msk.bf16.mxu0 %vm1320_vm0, %v1319_v0 }
 0x133   :  { %993 = vmatprep.subr.bf16.mxu0 %v1319_v0 }
 0x136   :  { %994 = vmatpush3.bf16.msra.mxu0 %v1400_v2 }
 0x137   :  { %995 = vmatprep.subr.bf16.mxu0 %v1319_v0 }
 0x13a   :  { %996 = vmatpush3.bf16.msra.mxu0 %v1404_v5 }
 0x13b   :  { %997 = vmatprep.subr.bf16.mxu0 %v1319_v0 }
 0x13e   :  { %998 = vmatpush3.bf16.msra.mxu0 %v1408_v7 }
 0x13f   :  { %999 = vmatprep.subr.bf16.mxu0 %v1319_v0 }
 0x142   :  { %1000 = vmatpush3.bf16.msra.mxu0 %v1413_v10 }
 0x143   :  { %1001 = vmatprep.subr.bf16.mxu0 %v1319_v0 }
 0x146   :  { %1002 = vmatpush3.bf16.msra.mxu0 %v1417_v12 }
 0x147   :  { %1003 = vmatprep.subr.bf16.mxu0 %v1319_v0 }
 0x14a   :  { %1004 = vmatpush3.bf16.msra.mxu0 %v1425_v13 }
 0x14b   :  { %1005 = vmatprep.subr.bf16.mxu0 %v1319_v0 }
 0x14e   :  { %1006 = vmatpush3.bf16.msra.mxu0 %v1431_v14 }
 0x14f   :  { %1031 = vmatprep.subr.bf16.mxu0 %v1319_v0 }
 0x1f1   :  { %v385_v37 = vpop.f32.mrf.mxu0 }
 0x1f2   :  { %v391_v38 = vadd.f32 %v385_v37, %v215_v36 }
 0x1f3   :  { %v969_v39 = vpop.f32.mrf.mxu0 }
 0x1f4   :  { %1148 = vtanh.f32 %v391_v38 }
 0x1f5   :  { %v388_v40 = vpop.f32.mrf.mxu0 }
 0x1f7   :  { %v970_v41 = vpop.f32.mrf.mxu0 }
 0x201   :  { %v1149_v42 = vpop.eup %1148 }
 0x202   :  { %v393_v43 = vpack.c.bf16 %v1149_v42, %v1149_v42 }
 0x204   :  { %988 = vmatmul.mubr.bf16.vlgmr.msra.gmra.mxu1 %v393_v43 }
 0x205   :  { %1012 = vmatpush3.bf16.msra.mxu1 %v1398_v1  ;;  %1027 = vmatprep.mubr.msk.bf16.mxu1 %vm1320_vm0, %v1319_v0 }
 0x206   :  { %1013 = vmatprep.subr.bf16.mxu1 %v1319_v0 }
 0x209   :  { %1014 = vmatpush3.bf16.msra.mxu1 %v1400_v2 }
 0x20a   :  { %1015 = vmatprep.subr.bf16.mxu1 %v1319_v0 }
 0x20d   :  { %1016 = vmatpush3.bf16.msra.mxu1 %v1404_v5 }
 0x20e   :  { %1017 = vmatprep.subr.bf16.mxu1 %v1319_v0 }
 0x211   :  { %1018 = vmatpush3.bf16.msra.mxu1 %v1408_v7 }
 0x212   :  { %1019 = vmatprep.subr.bf16.mxu1 %v1319_v0 }
 0x215   :  { %1020 = vmatpush3.bf16.msra.mxu1 %v1413_v10 }
 0x216   :  { %1021 = vmatprep.subr.bf16.mxu1 %v1319_v0 }
 0x219   :  { %1022 = vmatpush3.bf16.msra.mxu1 %v1417_v12 }
 0x21a   :  { %1023 = vmatprep.subr.bf16.mxu1 %v1319_v0 }
 0x21d   :  { %1024 = vmatpush3.bf16.msra.mxu1 %v1425_v13 }
 0x21e   :  { %1025 = vmatprep.subr.bf16.mxu1 %v1319_v0 }
 0x221   :  { %1026 = vmatpush3.bf16.msra.mxu1 %v1431_v14 }
 0x222   :  { %1051 = vmatprep.subr.bf16.mxu1 %v1319_v0 }
 0x2c4   :  { %v428_v45 = vpop.f32.mrf.mxu1 }
 0x2c5   :  { %v434_v46 = vadd.f32 %v428_v45, %v220_v44 }
 0x2c6   :  { %v989_v47 = vpop.f32.mrf.mxu1 }
 0x2c7   :  { %1150 = vtanh.f32 %v434_v46 }
 0x2c8   :  { %v431_v48 = vpop.f32.mrf.mxu1 }
 0x2ca   :  { %v990_v49 = vpop.f32.mrf.mxu1 }
 0x2d4   :  { %v1151_v50 = vpop.eup %1150 }
 0x2d5   :  { %v436_v51 = vpack.c.bf16 %v1151_v50, %v1151_v50 }
 0x2d7   :  { %1008 = vmatmul.mubr.bf16.vlgmr.msra.gmra.mxu0 %v436_v51 }
 0x2d8   :  { %1032 = vmatpush3.bf16.msra.mxu0 %v1398_v1  ;;  %1047 = vmatprep.mubr.msk.bf16.mxu0 %vm1320_vm0, %v1319_v0 }
 0x2d9   :  { %1033 = vmatprep.subr.bf16.mxu0 %v1319_v0 }
 0x2dc   :  { %1034 = vmatpush3.bf16.msra.mxu0 %v1400_v2 }
 0x2dd   :  { %1035 = vmatprep.subr.bf16.mxu0 %v1319_v0 }
 0x2e0   :  { %1036 = vmatpush3.bf16.msra.mxu0 %v1404_v5 }
 0x2e1   :  { %1037 = vmatprep.subr.bf16.mxu0 %v1319_v0 }
 0x2e4   :  { %1038 = vmatpush3.bf16.msra.mxu0 %v1408_v7 }
 0x2e5   :  { %1039 = vmatprep.subr.bf16.mxu0 %v1319_v0 }
 0x2e8   :  { %1040 = vmatpush3.bf16.msra.mxu0 %v1413_v10 }
 0x2e9   :  { %1041 = vmatprep.subr.bf16.mxu0 %v1319_v0 }
 0x2ec   :  { %1042 = vmatpush3.bf16.msra.mxu0 %v1417_v12 }
 0x2ed   :  { %1043 = vmatprep.subr.bf16.mxu0 %v1319_v0 }
 0x2f0   :  { %1044 = vmatpush3.bf16.msra.mxu0 %v1425_v13 }
 0x2f1   :  { %1045 = vmatprep.subr.bf16.mxu0 %v1319_v0 }
 0x2f4   :  { %1046 = vmatpush3.bf16.msra.mxu0 %v1431_v14 }
 0x2f5   :  { %1071 = vmatprep.subr.bf16.mxu0 %v1319_v0 }
 0x397   :  { %v471_v53 = vpop.f32.mrf.mxu0 }
 0x398   :  { %v477_v54 = vadd.f32 %v471_v53, %v223_v52 }
 0x399   :  { %v1009_v55 = vpop.f32.mrf.mxu0 }
 0x39a   :  { %1152 = vtanh.f32 %v477_v54 }
 0x39b   :  { %v474_v56 = vpop.f32.mrf.mxu0 }
 0x39d   :  { %v1010_v57 = vpop.f32.mrf.mxu0 }
 0x3a7   :  { %v1153_v58 = vpop.eup %1152 }
 0x3a8   :  { %v479_v59 = vpack.c.bf16 %v1153_v58, %v1153_v58 }
 0x3aa   :  { %1028 = vmatmul.mubr.bf16.vlgmr.msra.gmra.mxu1 %v479_v59 }
 0x3ab   :  { %1052 = vmatpush3.bf16.msra.mxu1 %v1398_v1  ;;  %1067 = vmatprep.mubr.msk.bf16.mxu1 %vm1320_vm0, %v1319_v0 }
 0x3ac   :  { %1053 = vmatprep.subr.bf16.mxu1 %v1319_v0 }
 0x3af   :  { %1054 = vmatpush3.bf16.msra.mxu1 %v1400_v2 }
 0x3b0   :  { %1055 = vmatprep.subr.bf16.mxu1 %v1319_v0 }
 0x3b3   :  { %1056 = vmatpush3.bf16.msra.mxu1 %v1404_v5 }
 0x3b4   :  { %1057 = vmatprep.subr.bf16.mxu1 %v1319_v0 }
 0x3b7   :  { %1058 = vmatpush3.bf16.msra.mxu1 %v1408_v7 }
 0x3b8   :  { %1059 = vmatprep.subr.bf16.mxu1 %v1319_v0 }
 0x3bb   :  { %1060 = vmatpush3.bf16.msra.mxu1 %v1413_v10 }
 0x3bc   :  { %1061 = vmatprep.subr.bf16.mxu1 %v1319_v0 }
 0x3bf   :  { %1062 = vmatpush3.bf16.msra.mxu1 %v1417_v12 }
 0x3c0   :  { %1063 = vmatprep.subr.bf16.mxu1 %v1319_v0 }
 0x3c3   :  { %1064 = vmatpush3.bf16.msra.mxu1 %v1425_v13 }
 0x3c4   :  { %1065 = vmatprep.subr.bf16.mxu1 %v1319_v0 }
 0x3c7   :  { %1066 = vmatpush3.bf16.msra.mxu1 %v1431_v14 }
 0x3c8   :  { %1091 = vmatprep.subr.bf16.mxu1 %v1319_v0 }
 0x46a   :  { %v514_v61 = vpop.f32.mrf.mxu1 }
 0x46b   :  { %v520_v62 = vadd.f32 %v514_v61, %v228_v60 }
 0x46c   :  { %v1029_v63 = vpop.f32.mrf.mxu1 }
 0x46d   :  { %1154 = vtanh.f32 %v520_v62 }
 0x46e   :  { %v517_v3 = vpop.f32.mrf.mxu1 }
 0x470   :  { %v1030_v4 = vpop.f32.mrf.mxu1 }
 0x47a   :  { %v1155_v6 = vpop.eup %1154 }
 0x47b   :  { %v522_v8 = vpack.c.bf16 %v1155_v6, %v1155_v6 }
 0x47d   :  { %1048 = vmatmul.mubr.bf16.vlgmr.msra.gmra.mxu0 %v522_v8 }
 0x47e   :  { %1072 = vmatpush3.bf16.msra.mxu0 %v1398_v1  ;;  %1087 = vmatprep.mubr.msk.bf16.mxu0 %vm1320_vm0, %v1319_v0  ;;  %v231_v1 = vadd.f32 %v1476_v20, %v1503_v35 }
 0x47f   :  { %1073 = vmatprep.subr.bf16.mxu0 %v1319_v0 }
 0x482   :  { %1074 = vmatpush3.bf16.msra.mxu0 %v1400_v2 }
 0x483   :  { %1075 = vmatprep.subr.bf16.mxu0 %v1319_v0 }
 0x486   :  { %1076 = vmatpush3.bf16.msra.mxu0 %v1404_v5 }
 0x487   :  { %1077 = vmatprep.subr.bf16.mxu0 %v1319_v0 }
 0x48a   :  { %1078 = vmatpush3.bf16.msra.mxu0 %v1408_v7 }
 0x48b   :  { %1079 = vmatprep.subr.bf16.mxu0 %v1319_v0 }
 0x48e   :  { %1080 = vmatpush3.bf16.msra.mxu0 %v1413_v10 }
 0x48f   :  { %1081 = vmatprep.subr.bf16.mxu0 %v1319_v0 }
 0x492   :  { %1082 = vmatpush3.bf16.msra.mxu0 %v1417_v12  ;;  %v1138_v12 = vld [vmem:[#allocation10 + $0x38] sm:$0xff]  }
 0x493   :  { %1083 = vmatprep.subr.bf16.mxu0 %v1319_v0 }
 0x496   :  { %1084 = vmatpush3.bf16.msra.mxu0 %v1425_v13  ;;  %v1139_v13 = vld [vmem:[#allocation10 + $0x30] sm:$0xff]  }
 0x497   :  { %1085 = vmatprep.subr.bf16.mxu0 %v1319_v0 }
 0x49a   :  { %1086 = vmatpush3.bf16.msra.mxu0 %v1431_v14  ;;  %v1140_v14 = vld [vmem:[#allocation10 + $0x28] sm:$0xff]  }
 0x53d   :  { %v557_v2 = vpop.f32.mrf.mxu0 }
 0x53e   :  { %v563_v5 = vadd.f32 %v557_v2, %v231_v1 }
 0x53f   :  { %v1049_v7 = vpop.f32.mrf.mxu0 }
 0x540   :  { %1156 = vtanh.f32 %v563_v5 }
 0x541   :  { %v560_v9 = vpop.f32.mrf.mxu0 }
 0x543   :  { %v1050_v10 = vpop.f32.mrf.mxu0 }
 0x54d   :  { %v1157_v11 = vpop.eup %1156 }
 0x54e   :  { %v565_v15 = vpack.c.bf16 %v1157_v11, %v1157_v11 }
 0x550   :  { %1068 = vmatmul.mubr.bf16.vlgmr.msra.gmra.mxu1 %v565_v15 }
 0x551   :  { %1107 = vmatprep.mubr.msk.bf16.mxu1 %vm1320_vm0, %v1319_v0  ;;  %1092 = vmatpush3.bf16.msra.mxu1 %v1138_v12 }
 0x552   :  { %1093 = vmatprep.subr.bf16.mxu1 %v1319_v0 }
 0x555   :  { %1094 = vmatpush3.bf16.msra.mxu1 %v1139_v13 }
 0x556   :  { %1095 = vmatprep.subr.bf16.mxu1 %v1319_v0 }
 0x559   :  { %1096 = vmatpush3.bf16.msra.mxu1 %v1140_v14 }
 0x55a   :  { %1097 = vmatprep.subr.bf16.mxu1 %v1319_v0 }
 0x55d   :  { %1098 = vmatpush3.bf16.msra.mxu1 %v1141_v25 }
 0x55e   :  { %1099 = vmatprep.subr.bf16.mxu1 %v1319_v0 }
 0x561   :  { %1100 = vmatpush3.bf16.msra.mxu1 %v1142_v26 }
 0x562   :  { %1101 = vmatprep.subr.bf16.mxu1 %v1319_v0 }
 0x565   :  { %1102 = vmatpush3.bf16.msra.mxu1 %v1143_v27 }
 0x566   :  { %1103 = vmatprep.subr.bf16.mxu1 %v1319_v0 }
 0x569   :  { %1104 = vmatpush3.bf16.msra.mxu1 %v1144_v28 }
 0x56a   :  { %1105 = vmatprep.subr.bf16.mxu1 %v1319_v0 }
 0x56d   :  { %1106 = vmatpush3.bf16.msra.mxu1 %v1145_v29 }
 0x610   :  { %v600_v17 = vpop.f32.mrf.mxu1 }
 0x611   :  { %v606_v18 = vadd.f32 %v600_v17, %v236_v16 }
 0x612   :  { %v1069_v19 = vpop.f32.mrf.mxu1 }
 0x613   :  { %1158 = vtanh.f32 %v606_v18 }
 0x614   :  { %v603_v21 = vpop.f32.mrf.mxu1 }
 0x616   :  { %v1070_v22 = vpop.f32.mrf.mxu1 }
 0x620   :  { %v1159_v23 = vpop.eup %1158 }
 0x621   :  { %v608_v24 = vpack.c.bf16 %v1159_v23, %v1159_v23 }
 0x623   :  { %1088 = vmatmul.mubr.bf16.vlgmr.msra.gmra.mxu0 %v608_v24 }
 0x6e3   :  { %v643_v31 = vpop.f32.mrf.mxu0 }
 0x6e4   :  { %v649_v32 = vadd.f32 %v643_v31, %v239_v30 }
 0x6e5   :  { %v1089_v33 = vpop.f32.mrf.mxu0 }
 0x6e6   :  { %1160 = vtanh.f32 %v649_v32 }
 0x6e7   :  { %v646_v35 = vpop.f32.mrf.mxu0 }
 0x6e9   :  { %v1090_v36 = vpop.f32.mrf.mxu0 }
 0x6f3   :  { %v1161_v37 = vpop.eup %1160 }
 0x6f4   :  { %651 = vst [vmem:[#allocation12] sm:$0xff] %v1161_v37  ;;  %v652_v38 = vpack.c.bf16 %v1161_v37, %v1161_v37 }
 0x6f6   :  { %1108 = vmatmul.mubr.bf16.vlgmr.msra.gmra.mxu1 %v652_v38 }
 0x6f7   :  { %1273 = shalt.err (!%p1270_p1)
}
 0x6f8   :  { %784 = dma.vmem_to_hbm [thread:$0]  %s782_s29, 128, %s1614_s8, [#allocation13]   ;;  %v817_v0 = vld [vmem:[%s1612_s6] ss:$0 sm:$0xff] }
 0x6f9   :  { %s1322_s13 = smov [#allocation11]  }
 0x6fa   :  { %s771_s14 = sshll.u32 %s1322_s13, 4  ;;  %s772_s14 = int_to_ptr.vmem [resolvable:$true] %s771_s14 }
 0x6fb   :  { %s1282_s15 = scalar_lea.vmem %s772_s14, 128  ;;  %p1287_p3 = scmp.lt.s32.totalorder %s772_s14, %s772_s14 }
 0x6fc   :  { %p1283_p2 = scmp.ne.s32.totalorder %s772_s14, %s1282_s15  ;;  %p1288_p4 = scmp.lt.s32.totalorder %s1282_s15, %s1282_s15 }
 0x6fe   :  { %p1289_p5 = por %p1288_p4, %p1287_p3 }
 0x700   :  { %p1290_p6 = pnand %p1289_p5, %p1283_p2 }
 0x7b6   :  { %v758_v20 = vpop.f32.mrf.mxu1 }
 0x7b7   :  { %v759_v34 = vadd.f32 %v817_v0, %v758_v20 }
 0x7b8   :  { %v1109_v39 = vpop.f32.mrf.mxu1 }
 0x7b9   :  { %764 = vst [vmem:[#allocation11] sm:$0xff] %v759_v34 }
 0x7ba   :  { %v761_v40 = vpop.f32.mrf.mxu1 }
 0x7bb   :  { %1293 = shalt.err (!%p1290_p6)
}
 0x7bc   :  { %774 = dma.vmem_to_hbm [thread:$0]  %s772_s14, 128, %s1613_s7, [#allocation4]   ;;  %v1110_v41 = vpop.f32.mrf.mxu1 }
 0x7bd   :  { %1308 = dma.done.wait [#allocation4], 128  }
 0x7be   :  { %1309 = vsyncadd [#allocation4], 4294967168 }
 0x7bf   :  { %1310 = dma.done.wait [#allocation13], 128  }
 0x7c0   :  { %1311 = vsyncadd [#allocation13], 4294967168 }
 0x7c1   :  { %791 = vsyncpa [#allocation3], 1 }
 0x7c2   :  { %792 = vsyncpa [#allocation6], 1 }
 0x7c3   :  { %793 = vsyncpa [#allocation9], 1 }
 0x7c4   :  { %794 = vsyncpa [#allocation4], 1 }
 0x7c5   :  { %795 = vsyncpa [#allocation13], 1 }

</bundles_post_ra>
